<compile_context>
chip_gen: v6e
topology: v6e:2x2x1
jax: 0.10.0
libtpu: 0.0.40
codegen_flags: <defaults>
</compile_context>

<pallas_src>
import functools

import jax
import jax.numpy as jnp
from jax.experimental import pallas as pl
from jax.experimental.pallas import tpu as pltpu

LOG_STD_MIN = -20.0
LOG_STD_MAX = 2.0

LANE = 128      # TPU lane width
A_PAD = 128     # lane-padded width for each head's output
TM_MAX = 512    # max rows per grid step


def _round_up(x, m):
    return (x + m - 1) // m * m


def actor_kernel(state_ref, value_ref, eps_ref,
                 w_es_ref, w_ev_ref, b_emb_ref,
                 w_net_ref, b_net_ref,
                 w_head_ref, b_head_ref,
                 act_ref):
    """One TM-row tile: embedding -> num_layers x (Linear+ReLU) -> relu -> fused heads -> rsample."""
    f32 = jnp.float32
    bf16 = jnp.bfloat16

    # Embedding: concat([state, value]) @ W_emb + b_emb with the concat folded into two
    # matmuls on the pre-split weight (no concat materialized in HBM).
    h = (jnp.dot(state_ref[...], w_es_ref[...], preferred_element_type=f32)
         + jnp.dot(value_ref[...], w_ev_ref[...], preferred_element_type=f32)
         + b_emb_ref[...])

    # net: stack of Linear + ReLU, weights VMEM-resident, bf16 MXU inputs / f32 accumulate.
    # TODO(synk): the injected `net` arch is unknown in the PyTorch module; a Linear+ReLU stack
    # is assumed, and `mask` is unused. For large num_layers*d_model^2, stream w_net per layer
    # (pltpu.emit_pipeline) instead of keeping it resident (v7x 64 MiB VMEM budget).
    num_layers = w_net_ref.shape[0]
    for l in range(num_layers):
        h = jnp.dot(h.astype(bf16), w_net_ref[l], preferred_element_type=f32) + b_net_ref[l]
        h = jnp.maximum(h, 0.0)

    # _compute_forward_pass applies ReLU to the net output again (redundant but kept for parity).
    y = jnp.maximum(h, 0.0)

    # Fused mean / log_std heads: a single lane-dense MXU push over 2*A_PAD columns.
    head = jnp.dot(y.astype(bf16), w_head_ref[...], preferred_element_type=f32) + b_head_ref[...]
    a_pad = head.shape[-1] // 2
    mu = head[:, :a_pad]
    log_std = jnp.clip(head[:, a_pad:], LOG_STD_MIN, LOG_STD_MAX)
    sigma = jnp.exp(log_std)

    # Normal(mu, sigma).rsample(); lane-dense (TM, A_PAD) store.
    act_ref[...] = mu + sigma * eps_ref[...]


def prepare_params(params, state_size, value_size):
    """One-time host-side prep: pad d_model / action dims to lane multiples (zeros, exact math),
    split the embedding weight, fuse the two heads, and cast matmul weights to bf16."""
    w_emb = params["w_emb"]
    d_model = w_emb.shape[-1]
    action_size = params["w_mu"].shape[-1]
    num_layers = params["w_net"].shape[0]
    d_pad = _round_up(max(d_model, LANE), LANE)

    def pad_to(x, shape):
        return jnp.pad(x, [(0, t - s) for s, t in zip(x.shape, shape)])

    w_emb_p = pad_to(w_emb, (state_size + value_size, d_pad))

    w_head = jnp.zeros((d_pad, 2 * A_PAD), jnp.float32)
    w_head = w_head.at[:d_model, :action_size].set(params["w_mu"])
    w_head = w_head.at[:d_model, A_PAD:A_PAD + action_size].set(params["w_ls"])
    b_head = jnp.zeros((1, 2 * A_PAD), jnp.float32)
    b_head = b_head.at[:, :action_size].set(params["b_mu"])
    b_head = b_head.at[:, A_PAD:A_PAD + action_size].set(params["b_ls"])

    return {
        "w_emb_s": w_emb_p[:state_size].astype(jnp.bfloat16),
        "w_emb_v": w_emb_p[state_size:].astype(jnp.bfloat16),
        "b_emb": pad_to(params["b_emb"], (1, d_pad)).astype(jnp.float32),
        "w_net": pad_to(params["w_net"], (num_layers, d_pad, d_pad)).astype(jnp.bfloat16),
        "b_net": pad_to(params["b_net"], (num_layers, 1, d_pad)).astype(jnp.float32),
        "w_head": w_head.astype(jnp.bfloat16),
        "b_head": b_head,
    }


@functools.partial(jax.jit, static_argnames=("tm",))
def dual_input_actor_forward(prep, state, value, eps, tm=None):
    """DualInputActor.forward (stochastic path): action = mu + sigma * eps."""
    B, S, state_size = state.shape
    value_size = value.shape[-1]
    A = eps.shape[-1]
    M = B * S
    d_pad = prep["w_emb_s"].shape[-1]
    a2 = prep["w_head"].shape[-1]          # 2 * A_PAD
    a_pad = a2 // 2

    if tm is None:
        tm = min(TM_MAX, _round_up(M, 16))  # bf16 row tiles: multiple of 16
    m_pad = _round_up(M, tm)
    grid_m = m_pad // tm

    def pad_rows(x2, cols):
        return jnp.pad(x2, ((0, m_pad - M), (0, cols - x2.shape[-1])))

    state2 = pad_rows(state.reshape(M, state_size), state_size).astype(jnp.bfloat16)
    value2 = pad_rows(value.reshape(M, value_size), value_size).astype(jnp.bfloat16)
    # TODO(synk): eps could be generated in-kernel (pltpu.prng_seed + pltpu.stateful_normal) to
    # drop this input stream entirely; kept as an explicit input for deterministic verification.
    eps2 = pad_rows(eps.reshape(M, A).astype(jnp.float32), a_pad)

    def row_spec(cols):
        return pl.BlockSpec((tm, cols), lambda i: (i, 0))

    def resident_spec(shape):
        nd = len(shape)
        return pl.BlockSpec(shape, lambda i, _nd=nd: (0,) * _nd)

    args = (state2, value2, eps2,
            prep["w_emb_s"], prep["w_emb_v"], prep["b_emb"],
            prep["w_net"], prep["b_net"],
            prep["w_head"], prep["b_head"])

    in_specs = ([row_spec(state_size), row_spec(value_size), row_spec(a_pad)]
                + [resident_spec(a.shape) for a in args[3:]])

    num_layers = prep["w_net"].shape[0]
    flops = 2 * m_pad * ((state_size + value_size) * d_pad
                         + num_layers * d_pad * d_pad + d_pad * a2)
    bytes_accessed = int(sum(int(a.size) * a.dtype.itemsize for a in args) + m_pad * a_pad * 4)

    out = pl.pallas_call(
        actor_kernel,
        out_shape=jax.ShapeDtypeStruct((m_pad, a_pad), jnp.float32),
        grid=(grid_m,),
        in_specs=in_specs,
        out_specs=row_spec(a_pad),
        compiler_params=pltpu.CompilerParams(
            dimension_semantics=("parallel",),
            vmem_limit_bytes=64 * 1024 * 1024),
        cost_estimate=pl.CostEstimate(
            flops=int(flops),
            transcendentals=int(m_pad * a_pad),
            bytes_accessed=bytes_accessed),
    )(*args)

    return out[:M, :A].reshape(B, S, A)


# ---------------- references (pure JAX, for correctness checking) ----------------

def _reference_forward_bf16(prep, state, value, eps):
    """Reference applying the same bf16 rounding / fusion / padding as the kernel."""
    B, S, _ = state.shape
    A = eps.shape[-1]
    f32 = jnp.float32
    s = state.reshape(B * S, -1).astype(jnp.bfloat16)
    v = value.reshape(B * S, -1).astype(jnp.bfloat16)
    h = (jnp.dot(s, prep["w_emb_s"], preferred_element_type=f32)
         + jnp.dot(v, prep["w_emb_v"], preferred_element_type=f32)
         + prep["b_emb"])
    for l in range(prep["w_net"].shape[0]):
        h = jnp.maximum(
            jnp.dot(h.astype(jnp.bfloat16), prep["w_net"][l], preferred_element_type=f32)
            + prep["b_net"][l], 0.0)
    y = jnp.maximum(h, 0.0)
    head = jnp.dot(y.astype(jnp.bfloat16), prep["w_head"], preferred_element_type=f32) + prep["b_head"]
    a_pad = head.shape[-1] // 2
    mu = head[:, :A]
    log_std = jnp.clip(head[:, a_pad:a_pad + A], LOG_STD_MIN, LOG_STD_MAX)
    act = mu + jnp.exp(log_std) * eps.reshape(B * S, A)
    return act.reshape(B, S, A)


def _reference_forward_f32(params, state, value, eps):
    """Pure-f32 reference on the original (unfused, unpadded) params."""
    x = jnp.concatenate([state, value], axis=-1).astype(jnp.float32)
    h = x @ params["w_emb"] + params["b_emb"]
    for l in range(params["w_net"].shape[0]):
        h = jnp.maximum(h @ params["w_net"][l] + params["b_net"][l], 0.0)
    y = jnp.maximum(h, 0.0)
    mu = y @ params["w_mu"] + params["b_mu"]
    log_std = jnp.clip(y @ params["w_ls"] + params["b_ls"], LOG_STD_MIN, LOG_STD_MAX)
    return mu + jnp.exp(log_std) * eps


def init_params(key, input_size, d_model, action_size, num_layers):
    ks = jax.random.split(key, 4)
    scale_in = 1.0 / jnp.sqrt(jnp.float32(input_size))
    scale_d = 1.0 / jnp.sqrt(jnp.float32(d_model))
    return {
        "w_emb": jax.random.normal(ks[0], (input_size, d_model), jnp.float32) * scale_in,
        "b_emb": jnp.zeros((1, d_model), jnp.float32),
        "w_net": jax.random.normal(ks[1], (num_layers, d_model, d_model), jnp.float32) * scale_d,
        "b_net": jnp.zeros((num_layers, 1, d_model), jnp.float32),
        "w_mu": jax.random.normal(ks[2], (d_model, action_size), jnp.float32) * scale_d,
        "b_mu": jnp.zeros((1, action_size), jnp.float32),
        "w_ls": jax.random.normal(ks[3], (d_model, action_size), jnp.float32) * scale_d,
        "b_ls": jnp.zeros((1, action_size), jnp.float32),   # init_log_std -> std ~ 1
    }


if __name__ == "__main__":
    key = jax.random.PRNGKey(0)

    # Small shapes consistent with the module.
    B, S = 4, 8
    state_size, value_size = 6, 2
    d_model, action_size, num_layers = 32, 4, 2
    input_size = state_size + value_size

    k_par, k_state, k_value, k_eps = jax.random.split(key, 4)
    params = init_params(k_par, input_size, d_model, action_size, num_layers)
    prep = prepare_params(params, state_size, value_size)

    state = jax.random.normal(k_state, (B, S, state_size), jnp.float32)
    value = jax.random.normal(k_value, (B, S, value_size), jnp.float32)
    eps = jax.random.normal(k_eps, (B, S, action_size), jnp.float32)  # reparameterization noise

    # tm=16 -> grid=(2,): exercises the tiled / pipelined path even at these demo shapes.
    action = dual_input_actor_forward(prep, state, value, eps, tm=16)
    action = jax.block_until_ready(action)
    assert action.shape == (B, S, action_size)

    # Tight check vs a reference that mirrors the kernel's bf16/fusion/padding exactly.
    ref_bf16 = _reference_forward_bf16(prep, state, value, eps)
    assert jnp.allclose(action, ref_bf16, atol=1e-2, rtol=1e-2), \
        float(jnp.max(jnp.abs(action - ref_bf16)))

    # Loose sanity check vs the original pure-f32 module semantics (bf16 quantization only).
    ref_f32 = _reference_forward_f32(params, state, value, eps)
    assert jnp.allclose(action, ref_f32, atol=0.25, rtol=0.25), \
        float(jnp.max(jnp.abs(action - ref_f32)))

    print("KERNEL_OK")
</pallas_src>

<mosaic_0001>
module attributes {stable_mosaic.version = 11 : i64} {
  func.func @actor_kernel(%arg0: i32, %arg1: memref<16x6xbf16, #tpu.memory_space<vmem>>, %arg2: memref<16x2xbf16, #tpu.memory_space<vmem>>, %arg3: memref<16x128xf32, #tpu.memory_space<vmem>>, %arg4: memref<6x128xbf16, #tpu.memory_space<vmem>>, %arg5: memref<2x128xbf16, #tpu.memory_space<vmem>>, %arg6: memref<1x128xf32, #tpu.memory_space<vmem>>, %arg7: memref<2x128x128xbf16, #tpu.memory_space<vmem>>, %arg8: memref<2x1x128xf32, #tpu.memory_space<vmem>>, %arg9: memref<128x256xbf16, #tpu.memory_space<vmem>>, %arg10: memref<1x256xf32, #tpu.memory_space<vmem>>, %arg11: memref<16x128xf32, #tpu.memory_space<vmem>>) attributes {dimension_semantics = [#tpu.dimension_semantics<parallel>], iteration_bounds = array<i64: 2>, scalar_prefetch = 0 : i64, scratch_operands = 0 : i64, tpu.core_type = #tpu.core_type<tc>, window_params = [{transform_indices = @transform_0, window_bounds = array<i64: 16, 6>}, {transform_indices = @transform_1, window_bounds = array<i64: 16, 2>}, {transform_indices = @transform_2, window_bounds = array<i64: 16, 128>}, {pipeline_mode = #tpu.pipeline_mode<synchronous>, transform_indices = @transform_3, window_bounds = array<i64: 6, 128>}, {pipeline_mode = #tpu.pipeline_mode<synchronous>, transform_indices = @transform_4, window_bounds = array<i64: 2, 128>}, {pipeline_mode = #tpu.pipeline_mode<synchronous>, transform_indices = @transform_5, window_bounds = array<i64: 1, 128>}, {pipeline_mode = #tpu.pipeline_mode<synchronous>, transform_indices = @transform_6, window_bounds = array<i64: 2, 128, 128>}, {pipeline_mode = #tpu.pipeline_mode<synchronous>, transform_indices = @transform_7, window_bounds = array<i64: 2, 1, 128>}, {pipeline_mode = #tpu.pipeline_mode<synchronous>, transform_indices = @transform_8, window_bounds = array<i64: 128, 256>}, {pipeline_mode = #tpu.pipeline_mode<synchronous>, transform_indices = @transform_9, window_bounds = array<i64: 1, 256>}, {transform_indices = @transform_10, window_bounds = array<i64: 16, 128>}]} {
    %c0 = arith.constant 0 : index
    %c0_0 = arith.constant 0 : index
    %0 = vector.load %arg1[%c0, %c0_0] : memref<16x6xbf16, #tpu.memory_space<vmem>>, vector<16x6xbf16>
    %c0_1 = arith.constant 0 : index
    %c0_2 = arith.constant 0 : index
    %1 = vector.load %arg4[%c0_1, %c0_2] : memref<6x128xbf16, #tpu.memory_space<vmem>>, vector<6x128xbf16>
    %cst = arith.constant dense<0.000000e+00> : vector<16x128xf32>
    %2 = tpu.matmul %0, %1, %cst {dimension_numbers = #tpu.dot_dimension_numbers<[1], [0], [0], [1], [0, 0, 1, 1], [], []>} : vector<16x6xbf16>, vector<6x128xbf16>, vector<16x128xf32> -> vector<16x128xf32>
    %c0_3 = arith.constant 0 : index
    %c0_4 = arith.constant 0 : index
    %3 = vector.load %arg2[%c0_3, %c0_4] : memref<16x2xbf16, #tpu.memory_space<vmem>>, vector<16x2xbf16>
    %c0_5 = arith.constant 0 : index
    %c0_6 = arith.constant 0 : index
    %4 = vector.load %arg5[%c0_5, %c0_6] : memref<2x128xbf16, #tpu.memory_space<vmem>>, vector<2x128xbf16>
    %cst_7 = arith.constant dense<0.000000e+00> : vector<16x128xf32>
    %5 = tpu.matmul %3, %4, %cst_7 {dimension_numbers = #tpu.dot_dimension_numbers<[1], [0], [0], [1], [0, 0, 1, 1], [], []>} : vector<16x2xbf16>, vector<2x128xbf16>, vector<16x128xf32> -> vector<16x128xf32>
    %6 = arith.addf %2, %5 : vector<16x128xf32>
    %c0_8 = arith.constant 0 : index
    %c0_9 = arith.constant 0 : index
    %7 = vector.load %arg6[%c0_8, %c0_9] : memref<1x128xf32, #tpu.memory_space<vmem>>, vector<1x128xf32>
    %8 = vector.broadcast %7 : vector<1x128xf32> to vector<16x128xf32>
    %9 = arith.addf %6, %8 : vector<16x128xf32>
    %10 = arith.truncf %9 : vector<16x128xf32> to vector<16x128xbf16>
    %c0_10 = arith.constant 0 : index
    %c0_11 = arith.constant 0 : index
    %c0_12 = arith.constant 0 : index
    %11 = vector.load %arg7[%c0_10, %c0_11, %c0_12] : memref<2x128x128xbf16, #tpu.memory_space<vmem>>, vector<1x128x128xbf16>
    %12 = vector.shape_cast %11 : vector<1x128x128xbf16> to vector<128x128xbf16>
    %cst_13 = arith.constant dense<0.000000e+00> : vector<16x128xf32>
    %13 = tpu.matmul %10, %12, %cst_13 {dimension_numbers = #tpu.dot_dimension_numbers<[1], [0], [0], [1], [0, 0, 1, 1], [], []>} : vector<16x128xbf16>, vector<128x128xbf16>, vector<16x128xf32> -> vector<16x128xf32>
    %c0_14 = arith.constant 0 : index
    %c0_15 = arith.constant 0 : index
    %c0_16 = arith.constant 0 : index
    %14 = vector.load %arg8[%c0_14, %c0_15, %c0_16] : memref<2x1x128xf32, #tpu.memory_space<vmem>>, vector<1x1x128xf32>
    %15 = vector.shape_cast %14 : vector<1x1x128xf32> to vector<1x128xf32>
    %16 = vector.broadcast %15 : vector<1x128xf32> to vector<16x128xf32>
    %17 = arith.addf %13, %16 : vector<16x128xf32>
    %cst_17 = arith.constant 0.000000e+00 : f32
    %18 = vector.broadcast %cst_17 : f32 to vector<16x128xf32>
    %19 = arith.maximumf %17, %18 : vector<16x128xf32>
    %20 = arith.truncf %19 : vector<16x128xf32> to vector<16x128xbf16>
    %c1 = arith.constant 1 : index
    %c0_18 = arith.constant 0 : index
    %c0_19 = arith.constant 0 : index
    %21 = vector.load %arg7[%c1, %c0_18, %c0_19] : memref<2x128x128xbf16, #tpu.memory_space<vmem>>, vector<1x128x128xbf16>
    %22 = vector.shape_cast %21 : vector<1x128x128xbf16> to vector<128x128xbf16>
    %cst_20 = arith.constant dense<0.000000e+00> : vector<16x128xf32>
    %23 = tpu.matmul %20, %22, %cst_20 {dimension_numbers = #tpu.dot_dimension_numbers<[1], [0], [0], [1], [0, 0, 1, 1], [], []>} : vector<16x128xbf16>, vector<128x128xbf16>, vector<16x128xf32> -> vector<16x128xf32>
    %c1_21 = arith.constant 1 : index
    %c0_22 = arith.constant 0 : index
    %c0_23 = arith.constant 0 : index
    %24 = vector.load %arg8[%c1_21, %c0_22, %c0_23] : memref<2x1x128xf32, #tpu.memory_space<vmem>>, vector<1x1x128xf32>
    %25 = vector.shape_cast %24 : vector<1x1x128xf32> to vector<1x128xf32>
    %26 = vector.broadcast %25 : vector<1x128xf32> to vector<16x128xf32>
    %27 = arith.addf %23, %26 : vector<16x128xf32>
    %cst_24 = arith.constant 0.000000e+00 : f32
    %28 = vector.broadcast %cst_24 : f32 to vector<16x128xf32>
    %29 = arith.maximumf %27, %28 : vector<16x128xf32>
    %cst_25 = arith.constant 0.000000e+00 : f32
    %30 = vector.broadcast %cst_25 : f32 to vector<16x128xf32>
    %31 = arith.maximumf %29, %30 : vector<16x128xf32>
    %32 = arith.truncf %31 : vector<16x128xf32> to vector<16x128xbf16>
    %c0_26 = arith.constant 0 : index
    %c0_27 = arith.constant 0 : index
    %33 = vector.load %arg9[%c0_26, %c0_27] : memref<128x256xbf16, #tpu.memory_space<vmem>>, vector<128x256xbf16>
    %cst_28 = arith.constant dense<0.000000e+00> : vector<16x256xf32>
    %34 = tpu.matmul %32, %33, %cst_28 {dimension_numbers = #tpu.dot_dimension_numbers<[1], [0], [0], [1], [0, 0, 1, 1], [], []>} : vector<16x128xbf16>, vector<128x256xbf16>, vector<16x256xf32> -> vector<16x256xf32>
    %c0_29 = arith.constant 0 : index
    %c0_30 = arith.constant 0 : index
    %35 = vector.load %arg10[%c0_29, %c0_30] : memref<1x256xf32, #tpu.memory_space<vmem>>, vector<1x256xf32>
    %36 = vector.broadcast %35 : vector<1x256xf32> to vector<16x256xf32>
    %37 = arith.addf %34, %36 : vector<16x256xf32>
    %38 = vector.extract_strided_slice %37 {offsets = [0, 0], sizes = [16, 128], strides = [1, 1]} : vector<16x256xf32> to vector<16x128xf32>
    %39 = vector.extract_strided_slice %37 {offsets = [0, 128], sizes = [16, 128], strides = [1, 1]} : vector<16x256xf32> to vector<16x128xf32>
    %cst_31 = arith.constant -2.000000e+01 : f32
    %cst_32 = arith.constant 2.000000e+00 : f32
    %40 = vector.broadcast %cst_31 : f32 to vector<16x128xf32>
    %41 = arith.maximumf %40, %39 : vector<16x128xf32>
    %42 = vector.broadcast %cst_32 : f32 to vector<16x128xf32>
    %43 = arith.minimumf %42, %41 : vector<16x128xf32>
    %44 = math.exp %43 : vector<16x128xf32>
    %c0_33 = arith.constant 0 : index
    %c0_34 = arith.constant 0 : index
    %45 = vector.load %arg3[%c0_33, %c0_34] : memref<16x128xf32, #tpu.memory_space<vmem>>, vector<16x128xf32>
    %46 = arith.mulf %44, %45 : vector<16x128xf32>
    %47 = arith.addf %38, %46 : vector<16x128xf32>
    %c0_35 = arith.constant 0 : index
    %c0_36 = arith.constant 0 : index
    %48 = vector.load %arg11[%c0_35, %c0_36] : memref<16x128xf32, #tpu.memory_space<vmem>>, vector<16x128xf32>
    tpu.vector_store %arg11[%c0_35, %c0_36], %47 {strides = array<i32>} : memref<16x128xf32, #tpu.memory_space<vmem>>, vector<16x128xf32>,
    return
  }
  func.func @transform_0(%arg0: i32) -> (i32, i32) {
    %c0_i32 = arith.constant 0 : i32
    %c0_i32_0 = arith.constant 0 : i32
    return %arg0, %c0_i32 : i32, i32
  }
  func.func @transform_1(%arg0: i32) -> (i32, i32) {
    %c0_i32 = arith.constant 0 : i32
    %c0_i32_0 = arith.constant 0 : i32
    return %arg0, %c0_i32 : i32, i32
  }
  func.func @transform_2(%arg0: i32) -> (i32, i32) {
    %c0_i32 = arith.constant 0 : i32
    %c0_i32_0 = arith.constant 0 : i32
    return %arg0, %c0_i32 : i32, i32
  }
  func.func @transform_3(%arg0: i32) -> (i32, i32) {
    %c0_i32 = arith.constant 0 : i32
    %c0_i32_0 = arith.constant 0 : i32
    %c0_i32_1 = arith.constant 0 : i32
    return %c0_i32, %c0_i32_0 : i32, i32
  }
  func.func @transform_4(%arg0: i32) -> (i32, i32) {
    %c0_i32 = arith.constant 0 : i32
    %c0_i32_0 = arith.constant 0 : i32
    %c0_i32_1 = arith.constant 0 : i32
    return %c0_i32, %c0_i32_0 : i32, i32
  }
  func.func @transform_5(%arg0: i32) -> (i32, i32) {
    %c0_i32 = arith.constant 0 : i32
    %c0_i32_0 = arith.constant 0 : i32
    %c0_i32_1 = arith.constant 0 : i32
    return %c0_i32, %c0_i32_0 : i32, i32
  }
  func.func @transform_6(%arg0: i32) -> (i32, i32, i32) {
    %c0_i32 = arith.constant 0 : i32
    %c0_i32_0 = arith.constant 0 : i32
    %c0_i32_1 = arith.constant 0 : i32
    %c0_i32_2 = arith.constant 0 : i32
    return %c0_i32, %c0_i32_0, %c0_i32_1 : i32, i32, i32
  }
  func.func @transform_7(%arg0: i32) -> (i32, i32, i32) {
    %c0_i32 = arith.constant 0 : i32
    %c0_i32_0 = arith.constant 0 : i32
    %c0_i32_1 = arith.constant 0 : i32
    %c0_i32_2 = arith.constant 0 : i32
    return %c0_i32, %c0_i32_0, %c0_i32_1 : i32, i32, i32
  }
  func.func @transform_8(%arg0: i32) -> (i32, i32) {
    %c0_i32 = arith.constant 0 : i32
    %c0_i32_0 = arith.constant 0 : i32
    %c0_i32_1 = arith.constant 0 : i32
    return %c0_i32, %c0_i32_0 : i32, i32
  }
  func.func @transform_9(%arg0: i32) -> (i32, i32) {
    %c0_i32 = arith.constant 0 : i32
    %c0_i32_0 = arith.constant 0 : i32
    %c0_i32_1 = arith.constant 0 : i32
    return %c0_i32, %c0_i32_0 : i32, i32
  }
  func.func @transform_10(%arg0: i32) -> (i32, i32) {
    %c0_i32 = arith.constant 0 : i32
    %c0_i32_0 = arith.constant 0 : i32
    return %arg0, %c0_i32 : i32, i32
  }
}

</mosaic_0001>

<bundles_post_ra>
// kernel: dual_input_actor_forward.1
= control target key start
LH: loop header
LB: loop body
LE: loop exit
PB: predicated region body
PF: predicated region fallthrough
CT: control target
= control target key end

     0   :  { %15 = vsyncpa [#allocation3], 0  ;;  %s1356_s13 = smov 0   ;;  %s1496_s0 = inlined_call_operand.vmem [shape: bf16[32,6], index: 0, kind: input, shape index: {}]   ;;  %s1497_s1 = inlined_call_operand.vmem [shape: bf16[32,2], index: 1, kind: input, shape index: {}]   ;;  %s1498_s2 = inlined_call_operand.vmem [shape: f32[32,128], index: 2, kind: input, shape index: {}]   ;;  %s1499_s3 = inlined_call_operand.vmem [shape: bf16[6,128], index: 3, kind: input, shape index: {}]   ;;  %s1500_s4 = inlined_call_operand.vmem [shape: bf16[2,128], index: 4, kind: input, shape index: {}]   ;;  %s1501_s5 = inlined_call_operand.vmem [shape: f32[1,128], index: 5, kind: input, shape index: {}]   ;;  %s1502_s6 = inlined_call_operand.vmem [shape: bf16[2,128,128], index: 6, kind: input, shape index: {}]   ;;  %s1503_s7 = inlined_call_operand.vmem [shape: f32[2,1,128], index: 7, kind: input, shape index: {}]   ;;  %s1504_s8 = inlined_call_operand.hbm [shape: bf16[128,256], index: 8, kind: input, shape index: {}]   ;;  %s1505_s9 = inlined_call_operand.vmem [shape: f32[1,256], index: 9, kind: input, shape index: {}]   ;;  %s1506_s10 = inlined_call_operand.vmem [shape: f32[32,128], index: 10, kind: output, shape index: {}]  }
   0x1 LB: > { %s1040_s14 = sadd.s32 4294967295, %s1293_s13   ;;  %p1042_p0 = scmp.ge.s32.totalorder %s1293_s13, 1  ;;  %s1293_s13 = sphi %s1356_s13, %s21_s13  }
   0x2   : > { %p277_p1 = scmp.lt.s32.totalorder %s1293_s13, 3  ;;  %s1295_s15 = smov [#allocation2]  }
   0x3   : > { %s304_s16 = sshll.u32 %s1295_s15, 4  ;;  %p1368_p3 = scmp.eq.s32.totalorder %s1040_s14, 0  ;;  %s305_s16 = int_to_ptr.vmem [resolvable:$true] %s304_s16 }
   0x4   : > { %p1364_p2 = pnand %p1042_p0, %p277_p1  ;;  %s1268_s19 = scalar_lea.vmem %s305_s16, 2048 }
   0x5   : > { %p1269_p7 = scmp.ne.s32.totalorder %s305_s16, %s1268_s19  ;;  %p1276_p10 = scmp.lt.s32.totalorder %s305_s16, %s305_s16 }
   0x6   : > { %p1191_p4 = pneg %p1364_p2  ;;  %p1277_p11 = scmp.lt.s32.totalorder %s1268_s19, %s1268_s19 }
   0x8   : > { %p1192_p5 = pnand %p1368_p3, %p1191_p4  ;;  %p1278_p12 = por %p1277_p11, %p1276_p10 }
   0xa   : > { %p1259_p6 = pneg %p1192_p5 }
   0xc   : > { %p1271_p8 = pnand %p1269_p7, %p1259_p6 }
   0xe   : > { %p1272_p9 = pneg %p1271_p8 }
  0x10   : > { %p1279_p13 = pnand %p1278_p12, %p1272_p9 }
  0x12   : > { %1282 = shalt.err (!%p1279_p13)
}
  0x13   : > { %s1296_s20 = smov 128   ;;  %s1297_s21 = smov 8  }
  0x14   : > { %1194 = dma.hbm_to_vmem [thread:$0]  (!%p1192_p5), %s1504_s8, 2048, %s305_s16, [#allocation3], %s1296_s20, %s1296_s20, %s1297_s21  }
  0x15   : > { %350 = sbr.rel (%p1364_p2) target bundleno = 879 (0x36f), region = 60 }
  0x1a   : > { %1288 = dma.done.wait (%p1368_p3), [#allocation3], 2048  }
  0x1b   : > { %1290 = vsyncadd (%p1368_p3), [#allocation3], 4294965248  ;;  %s1047_s24 = sshll.u32 %s1040_s14, 1  ;;  %v1298_v0 = vmov 0.0   ;;  %vm1299_vm0 = vmmov 0   ;;  %vm438_vm1 = vcmask 1040384  }
  0x1c   : > { %1135 = vmatprep.subr.bf16.mxu1 %v1298_v0  ;;  %1137 = vmatprep.mubr.msk.bf16.mxu1 %vm1299_vm0, %v1298_v0  ;;  %p399_p0 = scmp.lt.s32.totalorder %s1047_s24, 3  ;;  %vm492_vm2 = vcmask 1042432   ;;  %v428_v1 = vld [vmem:[%s1500_s4] sm:$0x1]  ;;  %vm434_vm3 = vcmask 15360   ;;  %v1213_v6 = vld [vmem:[%s1502_s6 + $0x38] sm:$0xff]  }
  0x1d   : > { %1147 = vmatprep.subr.bf16.mxu0 %v1298_v0  ;;  %1163 = vmatprep.mubr.msk.bf16.mxu0 %vm1299_vm0, %v1298_v0  ;;  %v440_v2 = vsel %vm438_vm1, %v428_v1, 0  ;;  %v425_v4 = vld [vmem:[%s1499_s3] sm:$0x7]  ;;  %vm488_vm4 = vcmask 48128   ;;  %v1214_v7 = vld [vmem:[%s1502_s6 + $0x30] sm:$0xff]   ;;  %v1215_v9 = vld [vmem:[%s1502_s6 + $0x28] sm:$0xff]  }
  0x1e   : > { %s1510_s24 = smov (!%p399_p0, %s1047_s24), 3  ;;  %1136 = vmatpush3.bf16.msra.mxu1 %v440_v2  ;;  %v494_v5 = vsel %vm492_vm2, %v425_v4, 0  ;;  %1148 = vmatpush3.bf16.msra.mxu0 %v1213_v6  ;;  %v1216_v10 = vld [vmem:[%s1502_s6 + $0x20] sm:$0xff]   ;;  %v1217_v11 = vld [vmem:[%s1502_s6 + $0x18] sm:$0xff]   ;;  %v1218_v12 = vld [vmem:[%s1502_s6 + $0x10] sm:$0xff]   ;;  %v1300_v63 = vmov 0  }
  0x1f   : > { %s1048_s25 = sshll.u32 %s1510_s24, 2  ;;  %1141 = vmatprep.subr.bf16.mxu1 %v1298_v0  ;;  %1149 = vmatprep.subr.bf16.mxu0 %v1298_v0  ;;  %v1219_v13 = vld [vmem:[%s1502_s6 + $0x8] sm:$0xff]   ;;  %v1220_v14 = vld [vmem:[%s1502_s6] sm:$0xff]   ;;  %v1221_v15 = vld [vmem:[%s1502_s6 + $0x78] sm:$0xff]   ;;  %s1052_s21 = sshll.u32 %s1510_s24, 3 }
  0x20   : > { %s402_s28 = scalar_lea.vmem %s1496_s0, %s1048_s25  ;;  %s408_s11 = scalar_lea.vmem %s1497_s1, %s1048_s25  ;;  %v1222_v16 = vld [vmem:[%s1502_s6 + $0x70] sm:$0xff]   ;;  %v1223_v17 = vld [vmem:[%s1502_s6 + $0x68] sm:$0xff]   ;;  %v1224_v18 = vld [vmem:[%s1502_s6 + $0x60] sm:$0xff]  }
  0x21   : > { %v1211_v3 = vld [vmem:[%s408_s11] sm:$0xff]   ;;  %v1225_v19 = vld [vmem:[%s1502_s6 + $0x58] sm:$0xff]   ;;  %v1226_v34 = vld [vmem:[%s1502_s6 + $0x50] sm:$0xff]   ;;  %s414_s25 = scalar_lea.vmem %s1498_s2, %s1052_s21 }
  0x22   : > { %1138 = vmatmul.mubr.msk.bf16.vlgmr.msra.gmra.mxu1 %vm434_vm3, %v1211_v3  ;;  %v1212_v8 = vld [vmem:[%s402_s28] sm:$0xff]   ;;  %1150 = vmatpush3.bf16.msra.mxu0 %v1214_v7  ;;  %v1227_v35 = vld [vmem:[%s1502_s6 + $0x48] sm:$0xff]   ;;  %v1229_v37 = vld [vmem:[#allocation2 + $0x70] ss:$8 sps:$4 sm:$0xff]   ;;  %s420_s28 = scalar_lea.vmem %s1506_s10, %s1052_s21 }
  0x23   : > { %1142 = vmatpush3.bf16.msra.mxu1 %v494_v5  ;;  %1143 = vmatprep.mubr.msk.bf16.mxu1 %vm1299_vm0, %v1298_v0  ;;  %v1059_v27 = vld [vmem:[%s1501_s5] ss:$0 sm:$0xff]  ;;  %v1231_v38 = vld [vmem:[#allocation2 + $0x74] ss:$8 sps:$4 sm:$0xff]   ;;  %v1234_v39 = vld [vmem:[#allocation2 + $0x64] ss:$8 sps:$4 sm:$0xff]  }
  0x24   : > { %1167 = vmatprep.subr.bf16.mxu1 %v1298_v0  ;;  %1151 = vmatprep.subr.bf16.mxu0 %v1298_v0  ;;  %v1228_v36 = vld [vmem:[%s1502_s6 + $0x40] sm:$0xff]   ;;  %v1237_v41 = vld [vmem:[#allocation2 + $0x54] ss:$8 sps:$4 sm:$0xff]   ;;  %v1235_v42 = vld [vmem:[#allocation2 + $0x50] ss:$8 sps:$4 sm:$0xff]  }
  0x25   : > { %v1232_v40 = vld [vmem:[#allocation2 + $0x60] ss:$8 sps:$4 sm:$0xff]   ;;  %v1240_v43 = vld [vmem:[#allocation2 + $0x44] ss:$8 sps:$4 sm:$0xff]   ;;  %v1243_v45 = vld [vmem:[#allocation2 + $0x34] ss:$8 sps:$4 sm:$0xff]  }
  0x26   : > { %1152 = vmatpush3.bf16.msra.mxu0 %v1215_v9  ;;  %v1238_v44 = vld [vmem:[#allocation2 + $0x40] ss:$8 sps:$4 sm:$0xff]   ;;  %v1241_v46 = vld [vmem:[#allocation2 + $0x30] ss:$8 sps:$4 sm:$0xff]   ;;  %v1246_v57 = vld [vmem:[#allocation2 + $0x24] ss:$8 sps:$4 sm:$0xff]  }
  0x27   : > { %1153 = vmatprep.subr.bf16.mxu0 %v1298_v0  ;;  %v1060_v47 = vld [vmem:[%s1503_s7] ss:$0 sm:$0xff]  ;;  %v1249_v59 = vld [vmem:[#allocation2 + $0x14] ss:$8 sps:$4 sm:$0xff]   ;;  %v1247_v60 = vld [vmem:[#allocation2 + $0x10] ss:$8 sps:$4 sm:$0xff]  }
  0x28   : > { %v1244_v58 = vld [vmem:[#allocation2 + $0x20] ss:$8 sps:$4 sm:$0xff]   ;;  %v1252_v61 = vld [vmem:[#allocation2 + $0x4] ss:$8 sps:$4 sm:$0xff]  }
  0x29   : > { %v1250_v62 = vld [vmem:[#allocation2] ss:$8 sps:$4 sm:$0xff]  }
  0x2a   : > { %1144 = vmatmul.mubr.msk.bf16.vlgmr.msra.gmra.mxu1 %vm488_vm4, %v1212_v8  ;;  %1154 = vmatpush3.bf16.msra.mxu0 %v1216_v10 }
  0x2b   : > { %1183 = vmatprep.mubr.msk.bf16.mxu1 %vm1299_vm0, %v1298_v0  ;;  %1155 = vmatprep.subr.bf16.mxu0 %v1298_v0 }
  0x2c   : > { %1168 = vmatpush3.bf16.msra.mxu1 %v1221_v15  ;;  %v797_v15 = vld [vmem:[%s1505_s9] sm:$0x3] }
  0x2d   : > { %1169 = vmatprep.subr.bf16.mxu1 %v1298_v0 }
  0x2e   : > { %1156 = vmatpush3.bf16.msra.mxu0 %v1217_v11 }
  0x2f   : > { %1157 = vmatprep.subr.bf16.mxu0 %v1298_v0 }
  0x30   : > { %1170 = vmatpush3.bf16.msra.mxu1 %v1222_v16 }
  0x31   : > { %1171 = vmatprep.subr.bf16.mxu1 %v1298_v0 }
  0x32   : > { %1158 = vmatpush3.bf16.msra.mxu0 %v1218_v12  ;;  %v799_v12 = vlaneseq }
  0x33   : > { %1159 = vmatprep.subr.bf16.mxu0 %v1298_v0 }
  0x34   : > { %1172 = vmatpush3.bf16.msra.mxu1 %v1223_v17 }
  0x35   : > { %1173 = vmatprep.subr.bf16.mxu1 %v1298_v0 }
  0x36   : > { %1160 = vmatpush3.bf16.msra.mxu0 %v1219_v13  ;;  %v800_v13 = vshrl.u32 %v799_v12, 7 }
  0x37   : > { %1161 = vmatprep.subr.bf16.mxu0 %v1298_v0 }
  0x38   : > { %1174 = vmatpush3.bf16.msra.mxu1 %v1224_v18 }
  0x39   : > { %1175 = vmatprep.subr.bf16.mxu1 %v1298_v0 }
  0x3a   : > { %1162 = vmatpush3.bf16.msra.mxu0 %v1220_v14  ;;  %v805_v14 = vsub.s32 1, %v800_v13 }
  0x3b   : > { %889 = vmatprep.subr.bf16.mxu0 %v1231_v38 }
  0x3c   : > { %1176 = vmatpush3.bf16.msra.mxu1 %v1225_v19  ;;  %v806_v16 = vrot.slane %v797_v15, %v805_v14 }
  0x3d   : > { %1177 = vmatprep.subr.bf16.mxu1 %v1298_v0 }
  0x40   : > { %1178 = vmatpush3.bf16.msra.mxu1 %v1226_v34 }
  0x41   : > { %1179 = vmatprep.subr.bf16.mxu1 %v1298_v0 }
  0x44   : > { %1180 = vmatpush3.bf16.msra.mxu1 %v1227_v35  ;;  %v941_v35 = vld [vmem:[%s414_s25 + $0x8] sm:$0xff] }
  0x45   : > { %1181 = vmatprep.subr.bf16.mxu1 %v1298_v0  ;;  %v1086_v0 = vld [vmem:[%s1503_s7 + $0x1] ss:$0 sm:$0xff] }
  0x48   : > { %1182 = vmatpush3.bf16.msra.mxu1 %v1228_v36 }
  0xe2   : > { %v476_v20 = vpop.f32.mrf.mxu1 }
  0xe4   : > { %v1139_v21 = vpop.f32.mrf.mxu1 }
  0xe6   : > { %v479_v22 = vpop.f32.mrf.mxu1 }
  0xe8   : > { %v1140_v23 = vpop.f32.mrf.mxu1 }
  0xea   : > { %v530_v24 = vpop.f32.mrf.mxu1 }
  0xeb   : > { %v531_v26 = vadd.f32 %v530_v24, %v476_v20 }
  0xec   : > { %v1145_v25 = vpop.f32.mrf.mxu1 }
  0xed   : > { %v544_v31 = vadd.f32 %v1059_v27, %v531_v26 }
  0xee   : > { %v533_v28 = vpop.f32.mrf.mxu1 }
  0xef   : > { %v534_v29 = vadd.f32 %v533_v28, %v479_v22 }
  0xf0   : > { %v1146_v30 = vpop.f32.mrf.mxu1 }
  0xf1   : > { %v545_v32 = vadd.f32 %v1059_v27, %v534_v29  ;;  %v801_v29 = vsub.s32 0, %v800_v13 }
  0xf3   : > { %v546_v33 = vpack.c.bf16 %v545_v32, %v544_v31  ;;  %v802_v30 = vrot.slane %v797_v15, %v801_v29  ;;  %v940_v31 = vld [vmem:[%s414_s25] sm:$0xff] }
  0xf5   : > { %1164 = vmatmul.mubr.bf16.vlgmr.msra.gmra.mxu0 %v546_v33 }
  0xf6   : > { %890 = vmatpush1.bf16.msra.mxu0 %v1229_v37  ;;  %921 = vmatprep.mubr.bf16.mxu0 %v1300_v63 }
  0xf7   : > { %891 = vmatprep.subr.bf16.mxu0 %v1234_v39 }
  0xfa   : > { %892 = vmatpush1.bf16.msra.mxu0 %v1232_v40 }
  0xfb   : > { %893 = vmatprep.subr.bf16.mxu0 %v1237_v41 }
  0xfe   : > { %894 = vmatpush1.bf16.msra.mxu0 %v1235_v42 }
  0xff   : > { %895 = vmatprep.subr.bf16.mxu0 %v1240_v43 }
 0x102   : > { %896 = vmatpush1.bf16.msra.mxu0 %v1238_v44 }
 0x103   : > { %897 = vmatprep.subr.bf16.mxu0 %v1243_v45 }
 0x106   : > { %898 = vmatpush1.bf16.msra.mxu0 %v1241_v46 }
 0x107   : > { %899 = vmatprep.subr.bf16.mxu0 %v1246_v57 }
 0x10a   : > { %900 = vmatpush1.bf16.msra.mxu0 %v1244_v58 }
 0x10b   : > { %901 = vmatprep.subr.bf16.mxu0 %v1249_v59 }
 0x10e   : > { %902 = vmatpush1.bf16.msra.mxu0 %v1247_v60 }
 0x10f   : > { %903 = vmatprep.subr.bf16.mxu0 %v1252_v61 }
 0x112   : > { %904 = vmatpush1.bf16.msra.mxu0 %v1250_v62 }
 0x1b5   : > { %v652_v48 = vpop.f32.mrf.mxu0 }
 0x1b6   : > { %v653_v50 = vadd.f32 %v1060_v47, %v652_v48 }
 0x1b7   : > { %v1165_v49 = vpop.f32.mrf.mxu0 }
 0x1b8   : > { %v659_v54 = vmax.f32 %v653_v50, 0.0 }
 0x1b9   : > { %v655_v51 = vpop.f32.mrf.mxu0 }
 0x1ba   : > { %v656_v52 = vadd.f32 %v1060_v47, %v655_v51 }
 0x1bb   : > { %v1166_v53 = vpop.f32.mrf.mxu0 }
 0x1bc   : > { %v660_v55 = vmax.f32 %v656_v52, 0.0 }
 0x1be   : > { %v661_v56 = vpack.c.bf16 %v660_v55, %v659_v54 }
 0x1c0   : > { %1184 = vmatmul.mubr.bf16.vlgmr.msra.gmra.mxu1 %v661_v56 }
 0x280   : > { %v769_v1 = vpop.f32.mrf.mxu1 }
 0x281   : > { %v770_v2 = vadd.f32 %v1086_v0, %v769_v1 }
 0x282   : > { %v1185_v3 = vpop.f32.mrf.mxu1 }
 0x283   : > { %v776_v5 = vmax.f32 %v770_v2, 0.0 }
 0x284   : > { %v772_v4 = vpop.f32.mrf.mxu1 }
 0x285   : > { %v773_v6 = vadd.f32 %v1086_v0, %v772_v4  ;;  %v778_v9 = vmax.f32 %v776_v5, 0.0 }
 0x286   : > { %v1186_v7 = vpop.f32.mrf.mxu1 }
 0x287   : > { %v777_v8 = vmax.f32 %v773_v6, 0.0 }
 0x289   : > { %v779_v10 = vmax.f32 %v777_v8, 0.0 }
 0x28b   : > { %v780_v11 = vpack.c.bf16 %v779_v10, %v778_v9 }
 0x28d   : > { %922 = vmatmul.mubr.bf16.vlgmr.msra.gmra.mxu0 %v780_v11 }
 0x34d   : > { %v923_v17 = vpop.f32.mrf.mxu0 }
 0x34e   : > { %v924_v33 = vadd.f32 %v923_v17, %v802_v30 }
 0x34f   : > { %v925_v18 = vpop.f32.mrf.mxu0 }
 0x350   : > { %v926_v19 = vadd.f32 %v925_v18, %v806_v16 }
 0x351   : > { %v927_v20 = vpop.f32.mrf.mxu0 }
 0x352   : > { %v932_v21 = vmax.f32 %v926_v19, -20.0  ;;  %v928_v38 = vadd.f32 %v927_v20, %v802_v30 }
 0x353   : > { %v929_v22 = vpop.f32.mrf.mxu0 }
 0x354   : > { %v934_v23 = vmin.f32 %v932_v21, 2.0  ;;  %v930_v24 = vadd.f32 %v929_v22, %v806_v16 }
 0x356   : > { %v936_v25 = vmul.f32 1.442695, %v934_v23  ;;  %v933_v26 = vmax.f32 %v930_v24, -20.0 }
 0x358   : > { %1253 = vpow2.f32 %v936_v25  ;;  %v935_v27 = vmin.f32 %v933_v26, 2.0 }
 0x35a   : > { %v938_v28 = vmul.f32 1.442695, %v935_v27 }
 0x35c   : > { %1255 = vpow2.f32 %v938_v28 }
 0x365   : > { %v1254_v32 = vpop.eup %1253 }
 0x366   : > { %v942_v34 = vmul.f32 %v1254_v32, %v940_v31 }
 0x368   : > { %v944_v36 = vadd.f32 %v942_v34, %v924_v33 }
 0x369   : > { %v1256_v37 = vpop.eup %1255 }
 0x36a   : > { %946 = vst [vmem:[%s420_s28] sm:$0xff] %v944_v36  ;;  %v943_v39 = vmul.f32 %v1256_v37, %v941_v35 }
 0x36c   : > { %v945_v40 = vadd.f32 %v943_v39, %v928_v38 }
 0x36e   : > { %947 = vst [vmem:[%s420_s28 + $0x8] sm:$0xff] %v945_v40 }
 0x36f PF: > { %s21_s13 = sadd.s32 1, %s1293_s13  }
 0x370   : > { %p18_p1 = scmp.ge.s32.totalorder %s21_s13, 4  }
 0x372   :  { %20 = sbr.rel (!%p18_p1) target bundleno = 1 (0x1), region = 103 }
 0x377   :  { %970 = vsyncpa [#allocation3], 1 }
 0x378   :  { %972 = vsyncpa [#allocation3 + $0x1], 1 }

</bundles_post_ra>
